<compile_context>
chip_gen: v7x
topology: tpu7x:2x2x1
jax: 0.10.0
libtpu: 0.0.40
codegen_flags: <defaults>
</compile_context>

<pallas_src>
import jax
import jax.numpy as jnp
from jax.experimental import pallas as pl
from jax.experimental.pallas import tpu as pltpu

BN_EPS = 1e-5
SUBLANE = 8
NC_PAD = 8          # classes padded 2 -> 8 for a small, legal output block
NEG_INF = -1e30


def fcn_kernel(x_ref, w1_ref, b1_ref, w2_ref, b2_ref, w3_ref, b3_ref,
               w4_ref, b4_ref, o_ref):
    # Matmul operands in bf16 (single MXU pass); accumulate + vector math in f32.
    x = x_ref[...].astype(jnp.bfloat16)
    h = jnp.dot(x, w1_ref[...], preferred_element_type=jnp.float32) + b1_ref[...]
    h = jnp.maximum(h, 0.0)
    h = jnp.dot(h.astype(jnp.bfloat16), w2_ref[...],
                preferred_element_type=jnp.float32) + b2_ref[...]
    h = jnp.maximum(h, 0.0)
    h = jnp.dot(h.astype(jnp.bfloat16), w3_ref[...],
                preferred_element_type=jnp.float32) + b3_ref[...]
    h = jnp.maximum(h, 0.0)

    # fc4 -> softmax over the 8-lane class axis. Pad lanes have zero weights and
    # bias = -1e30, so exp underflows to 0 there and the row sum only counts the
    # real classes.
    logits = jnp.dot(h.astype(jnp.bfloat16), w4_ref[...],
                     preferred_element_type=jnp.float32) + b4_ref[...]
    mx = jnp.max(logits, axis=1, keepdims=True)
    e = jnp.exp(logits - mx)
    s = jnp.sum(e, axis=1, keepdims=True)
    o_ref[...] = (e * pl.reciprocal(s, approx=True)).astype(o_ref.dtype)


def _round_up(n, m):
    return (n + m - 1) // m * m


def fold_params(params, num_classes=2):
    """Prep-time: fold BN into Linear layers, cast matmul weights to bf16,
    and pad the classifier to NC_PAD output lanes."""
    (w1, b1, g1, be1, m1, v1,
     w2, b2, g2, be2, m2, v2,
     w3, b3, g3, be3, m3, v3,
     w4, b4) = params

    def fold(w, b, gamma, beta, mean, var):
        scale = gamma * jax.lax.rsqrt(var + BN_EPS)            # (1, out)
        return ((w * scale).astype(jnp.bfloat16),              # MXU operand
                (b - mean) * scale + beta)                     # bias stays f32

    w1f, b1f = fold(w1, b1, g1, be1, m1, v1)
    w2f, b2f = fold(w2, b2, g2, be2, m2, v2)
    w3f, b3f = fold(w3, b3, g3, be3, m3, v3)

    pad_n = NC_PAD - num_classes
    w4p = jnp.pad(w4, ((0, 0), (0, pad_n))).astype(jnp.bfloat16)
    b4p = jnp.pad(b4, ((0, 0), (0, pad_n)), constant_values=NEG_INF)  # f32

    return (w1f, b1f, w2f, b2f, w3f, b3f, w4p, b4p)


def fcn_forward(x, folded_params, *, num_classes=2, block_b=None):
    """x: (B, 5) float32. folded_params: output of fold_params()."""
    B, F = x.shape

    if block_b is None:
        if B <= 4096:
            block_b = B                      # block == full dim: always legal
            if B > 1024:
                # split into >= 2 grid steps so both v7x TensorCores get work
                block_b = _round_up(pl.cdiv(B, 2), SUBLANE)
        else:
            block_b = 4096
    grid_b = pl.cdiv(B, block_b)             # ragged last block handled by Pallas

    def weight_spec(p):
        return pl.BlockSpec(p.shape, lambda i: (0, 0))   # grid-invariant: VMEM-resident

    out = pl.pallas_call(
        fcn_kernel,
        out_shape=jax.ShapeDtypeStruct((B, NC_PAD), jnp.float32),
        grid_spec=pltpu.PrefetchScalarGridSpec(
            num_scalar_prefetch=0,
            grid=(grid_b,),
            in_specs=[pl.BlockSpec((block_b, F), lambda i: (i, 0))]
            + [weight_spec(p) for p in folded_params],
            out_specs=pl.BlockSpec((block_b, NC_PAD), lambda i: (i, 0)),
        ),
        compiler_params=pltpu.CompilerParams(
            dimension_semantics=("parallel",)),
    )(x, *folded_params)

    return out[:, :num_classes]


def init_params(key):
    """Deterministic synthetic parameters matching FCN.__init__ shapes."""
    dims = [(5, 32), (32, 64), (64, 128), (128, 2)]
    keys = jax.random.split(key, 16)
    ki = iter(range(16))
    params = []
    for li, (fin, fout) in enumerate(dims):
        # Linear: weight stored (in, out), bias (1, out)
        w = jax.random.normal(keys[next(ki)], (fin, fout), jnp.float32) * 0.1
        b = jax.random.normal(keys[next(ki)], (1, fout), jnp.float32) * 0.05
        params += [w, b]
        if li < 3:
            # BatchNorm1d: gamma, beta, running_mean, running_var (1, out)
            gamma = 1.0 + 0.1 * jax.random.normal(keys[next(ki)], (1, fout), jnp.float32)
            beta = 0.05 * jax.random.normal(keys[next(ki)], (1, fout), jnp.float32)
            mean = 0.02 * jnp.arange(fout, dtype=jnp.float32).reshape(1, fout)
            var = jnp.ones((1, fout), jnp.float32) + 0.01 * jnp.arange(
                fout, dtype=jnp.float32).reshape(1, fout)
            params += [gamma, beta, mean, var]
    return tuple(params)


def fcn_reference(x, params):
    """Pure-JAX full-precision reference using the ORIGINAL (unfolded) parameters."""
    (w1, b1, g1, be1, m1, v1,
     w2, b2, g2, be2, m2, v2,
     w3, b3, g3, be3, m3, v3,
     w4, b4) = params
    h = jnp.maximum((x @ w1 + b1 - m1) * jax.lax.rsqrt(v1 + BN_EPS) * g1 + be1, 0.0)
    h = jnp.maximum((h @ w2 + b2 - m2) * jax.lax.rsqrt(v2 + BN_EPS) * g2 + be2, 0.0)
    h = jnp.maximum((h @ w3 + b3 - m3) * jax.lax.rsqrt(v3 + BN_EPS) * g3 + be3, 0.0)
    logits = h @ w4 + b4
    return jax.nn.softmax(logits, axis=1)


def fcn_reference_folded(x, folded, num_classes=2):
    """Pure-JAX reference that mirrors the kernel's bf16-operand matmul math."""
    w1, b1, w2, b2, w3, b3, w4, b4 = folded
    h = jnp.maximum(jnp.dot(x.astype(jnp.bfloat16), w1,
                            preferred_element_type=jnp.float32) + b1, 0.0)
    h = jnp.maximum(jnp.dot(h.astype(jnp.bfloat16), w2,
                            preferred_element_type=jnp.float32) + b2, 0.0)
    h = jnp.maximum(jnp.dot(h.astype(jnp.bfloat16), w3,
                            preferred_element_type=jnp.float32) + b3, 0.0)
    logits = jnp.dot(h.astype(jnp.bfloat16), w4,
                     preferred_element_type=jnp.float32) + b4
    return jax.nn.softmax(logits, axis=1)[:, :num_classes]


if __name__ == "__main__":
    key = jax.random.PRNGKey(0)
    kx, kp = jax.random.split(key)

    B = 8  # batch; input features = 5 per nn.Linear(5, 32)
    x = jax.random.normal(kx, (B, 5), jnp.float32)
    params = init_params(kp)
    folded = fold_params(params)

    out = fcn_forward(x, folded)
    out = jax.block_until_ready(out)

    assert out.shape == (B, 2)
    # Tight check vs a pure-JAX reference that mirrors the kernel's bf16 matmuls.
    ref_b = fcn_reference_folded(x, folded)
    assert jnp.allclose(out, ref_b, atol=5e-3, rtol=5e-3), "mismatch vs bf16 reference"
    # Loose check vs the full-precision f32 reference (bf16 weight/activation rounding).
    ref_f = fcn_reference(x, params)
    assert jnp.allclose(out, ref_f, atol=3e-2, rtol=3e-2), "mismatch vs f32 reference"
    # Rows sum to 1 (approx reciprocal introduces ~2^-12 relative error).
    assert jnp.allclose(jnp.sum(out, axis=1), 1.0, atol=5e-3), "softmax rows != 1"

    print("KERNEL_OK")
</pallas_src>

<mosaic_0001>
module attributes {stable_mosaic.version = 11 : i64} {
  func.func @fcn_kernel(%arg0: i32, %arg1: memref<8x5xf32, #tpu.memory_space<vmem>>, %arg2: memref<5x32xbf16, #tpu.memory_space<vmem>>, %arg3: memref<1x32xf32, #tpu.memory_space<vmem>>, %arg4: memref<32x64xbf16, #tpu.memory_space<vmem>>, %arg5: memref<1x64xf32, #tpu.memory_space<vmem>>, %arg6: memref<64x128xbf16, #tpu.memory_space<vmem>>, %arg7: memref<1x128xf32, #tpu.memory_space<vmem>>, %arg8: memref<128x8xbf16, #tpu.memory_space<vmem>>, %arg9: memref<1x8xf32, #tpu.memory_space<vmem>>, %arg10: memref<8x8xf32, #tpu.memory_space<vmem>>) attributes {dimension_semantics = [#tpu.dimension_semantics<parallel>], iteration_bounds = array<i64: 1>, scalar_prefetch = 0 : i64, scratch_operands = 0 : i64, tpu.core_type = #tpu.core_type<tc>, window_params = [{transform_indices = @transform_0, window_bounds = array<i64: 8, 5>}, {pipeline_mode = #tpu.pipeline_mode<synchronous>, transform_indices = @transform_1, window_bounds = array<i64: 5, 32>}, {pipeline_mode = #tpu.pipeline_mode<synchronous>, transform_indices = @transform_2, window_bounds = array<i64: 1, 32>}, {pipeline_mode = #tpu.pipeline_mode<synchronous>, transform_indices = @transform_3, window_bounds = array<i64: 32, 64>}, {pipeline_mode = #tpu.pipeline_mode<synchronous>, transform_indices = @transform_4, window_bounds = array<i64: 1, 64>}, {pipeline_mode = #tpu.pipeline_mode<synchronous>, transform_indices = @transform_5, window_bounds = array<i64: 64, 128>}, {pipeline_mode = #tpu.pipeline_mode<synchronous>, transform_indices = @transform_6, window_bounds = array<i64: 1, 128>}, {pipeline_mode = #tpu.pipeline_mode<synchronous>, transform_indices = @transform_7, window_bounds = array<i64: 128, 8>}, {pipeline_mode = #tpu.pipeline_mode<synchronous>, transform_indices = @transform_8, window_bounds = array<i64: 1, 8>}, {transform_indices = @transform_9, window_bounds = array<i64: 8, 8>}]} {
    %c0 = arith.constant 0 : index
    %c0_0 = arith.constant 0 : index
    %0 = vector.load %arg1[%c0, %c0_0] : memref<8x5xf32, #tpu.memory_space<vmem>>, vector<8x5xf32>
    %1 = arith.truncf %0 : vector<8x5xf32> to vector<8x5xbf16>
    %c0_1 = arith.constant 0 : index
    %c0_2 = arith.constant 0 : index
    %2 = vector.load %arg2[%c0_1, %c0_2] : memref<5x32xbf16, #tpu.memory_space<vmem>>, vector<5x32xbf16>
    %cst = arith.constant dense<0.000000e+00> : vector<8x32xf32>
    %3 = tpu.matmul %1, %2, %cst {dimension_numbers = #tpu.dot_dimension_numbers<[1], [0], [0], [1], [0, 0, 1, 1], [], []>} : vector<8x5xbf16>, vector<5x32xbf16>, vector<8x32xf32> -> vector<8x32xf32>
    %c0_3 = arith.constant 0 : index
    %c0_4 = arith.constant 0 : index
    %4 = vector.load %arg3[%c0_3, %c0_4] : memref<1x32xf32, #tpu.memory_space<vmem>>, vector<1x32xf32>
    %5 = vector.broadcast %4 : vector<1x32xf32> to vector<8x32xf32>
    %6 = arith.addf %3, %5 : vector<8x32xf32>
    %cst_5 = arith.constant 0.000000e+00 : f32
    %7 = vector.broadcast %cst_5 : f32 to vector<8x32xf32>
    %8 = arith.maximumf %6, %7 : vector<8x32xf32>
    %9 = arith.truncf %8 : vector<8x32xf32> to vector<8x32xbf16>
    %c0_6 = arith.constant 0 : index
    %c0_7 = arith.constant 0 : index
    %10 = vector.load %arg4[%c0_6, %c0_7] : memref<32x64xbf16, #tpu.memory_space<vmem>>, vector<32x64xbf16>
    %cst_8 = arith.constant dense<0.000000e+00> : vector<8x64xf32>
    %11 = tpu.matmul %9, %10, %cst_8 {dimension_numbers = #tpu.dot_dimension_numbers<[1], [0], [0], [1], [0, 0, 1, 1], [], []>} : vector<8x32xbf16>, vector<32x64xbf16>, vector<8x64xf32> -> vector<8x64xf32>
    %c0_9 = arith.constant 0 : index
    %c0_10 = arith.constant 0 : index
    %12 = vector.load %arg5[%c0_9, %c0_10] : memref<1x64xf32, #tpu.memory_space<vmem>>, vector<1x64xf32>
    %13 = vector.broadcast %12 : vector<1x64xf32> to vector<8x64xf32>
    %14 = arith.addf %11, %13 : vector<8x64xf32>
    %cst_11 = arith.constant 0.000000e+00 : f32
    %15 = vector.broadcast %cst_11 : f32 to vector<8x64xf32>
    %16 = arith.maximumf %14, %15 : vector<8x64xf32>
    %17 = arith.truncf %16 : vector<8x64xf32> to vector<8x64xbf16>
    %c0_12 = arith.constant 0 : index
    %c0_13 = arith.constant 0 : index
    %18 = vector.load %arg6[%c0_12, %c0_13] : memref<64x128xbf16, #tpu.memory_space<vmem>>, vector<64x128xbf16>
    %cst_14 = arith.constant dense<0.000000e+00> : vector<8x128xf32>
    %19 = tpu.matmul %17, %18, %cst_14 {dimension_numbers = #tpu.dot_dimension_numbers<[1], [0], [0], [1], [0, 0, 1, 1], [], []>} : vector<8x64xbf16>, vector<64x128xbf16>, vector<8x128xf32> -> vector<8x128xf32>
    %c0_15 = arith.constant 0 : index
    %c0_16 = arith.constant 0 : index
    %20 = vector.load %arg7[%c0_15, %c0_16] : memref<1x128xf32, #tpu.memory_space<vmem>>, vector<1x128xf32>
    %21 = vector.broadcast %20 : vector<1x128xf32> to vector<8x128xf32>
    %22 = arith.addf %19, %21 : vector<8x128xf32>
    %cst_17 = arith.constant 0.000000e+00 : f32
    %23 = vector.broadcast %cst_17 : f32 to vector<8x128xf32>
    %24 = arith.maximumf %22, %23 : vector<8x128xf32>
    %25 = arith.truncf %24 : vector<8x128xf32> to vector<8x128xbf16>
    %c0_18 = arith.constant 0 : index
    %c0_19 = arith.constant 0 : index
    %26 = vector.load %arg8[%c0_18, %c0_19] : memref<128x8xbf16, #tpu.memory_space<vmem>>, vector<128x8xbf16>
    %cst_20 = arith.constant dense<0.000000e+00> : vector<8x8xf32>
    %27 = tpu.matmul %25, %26, %cst_20 {dimension_numbers = #tpu.dot_dimension_numbers<[1], [0], [0], [1], [0, 0, 1, 1], [], []>} : vector<8x128xbf16>, vector<128x8xbf16>, vector<8x8xf32> -> vector<8x8xf32>
    %c0_21 = arith.constant 0 : index
    %c0_22 = arith.constant 0 : index
    %28 = vector.load %arg9[%c0_21, %c0_22] : memref<1x8xf32, #tpu.memory_space<vmem>>, vector<1x8xf32>
    %29 = vector.broadcast %28 : vector<1x8xf32> to vector<8x8xf32>
    %30 = arith.addf %27, %29 : vector<8x8xf32>
    %cst_23 = arith.constant dense<0xFF800000> : vector<8xf32>
    %31 = vector.multi_reduction <maximumf>, %30, %cst_23 [1] : vector<8x8xf32> to vector<8xf32>
    %32 = vector.shape_cast %31 : vector<8xf32> to vector<8x1xf32>
    %33 = vector.broadcast %32 : vector<8x1xf32> to vector<8x8xf32>
    %34 = arith.subf %30, %33 : vector<8x8xf32>
    %35 = math.exp %34 : vector<8x8xf32>
    %cst_24 = arith.constant dense<0.000000e+00> : vector<8xf32>
    %36 = vector.multi_reduction <add>, %35, %cst_24 [1] : vector<8x8xf32> to vector<8xf32>
    %37 = vector.shape_cast %36 : vector<8xf32> to vector<8x1xf32>
    %38 = tpu.reciprocal %37 {approx = true} : vector<8x1xf32> -> vector<8x1xf32>
    %39 = vector.broadcast %38 : vector<8x1xf32> to vector<8x8xf32>
    %40 = arith.mulf %35, %39 : vector<8x8xf32>
    %c0_25 = arith.constant 0 : index
    %c0_26 = arith.constant 0 : index
    %41 = vector.load %arg10[%c0_25, %c0_26] : memref<8x8xf32, #tpu.memory_space<vmem>>, vector<8x8xf32>
    tpu.vector_store %arg10[%c0_25, %c0_26], %40 {strides = array<i32>} : memref<8x8xf32, #tpu.memory_space<vmem>>, vector<8x8xf32>,
    return
  }
  func.func @transform_0(%arg0: i32) -> (i32, i32) {
    %c0_i32 = arith.constant 0 : i32
    %c0_i32_0 = arith.constant 0 : i32
    return %arg0, %c0_i32 : i32, i32
  }
  func.func @transform_1(%arg0: i32) -> (i32, i32) {
    %c0_i32 = arith.constant 0 : i32
    %c0_i32_0 = arith.constant 0 : i32
    %c0_i32_1 = arith.constant 0 : i32
    return %c0_i32, %c0_i32_0 : i32, i32
  }
  func.func @transform_2(%arg0: i32) -> (i32, i32) {
    %c0_i32 = arith.constant 0 : i32
    %c0_i32_0 = arith.constant 0 : i32
    %c0_i32_1 = arith.constant 0 : i32
    return %c0_i32, %c0_i32_0 : i32, i32
  }
  func.func @transform_3(%arg0: i32) -> (i32, i32) {
    %c0_i32 = arith.constant 0 : i32
    %c0_i32_0 = arith.constant 0 : i32
    %c0_i32_1 = arith.constant 0 : i32
    return %c0_i32, %c0_i32_0 : i32, i32
  }
  func.func @transform_4(%arg0: i32) -> (i32, i32) {
    %c0_i32 = arith.constant 0 : i32
    %c0_i32_0 = arith.constant 0 : i32
    %c0_i32_1 = arith.constant 0 : i32
    return %c0_i32, %c0_i32_0 : i32, i32
  }
  func.func @transform_5(%arg0: i32) -> (i32, i32) {
    %c0_i32 = arith.constant 0 : i32
    %c0_i32_0 = arith.constant 0 : i32
    %c0_i32_1 = arith.constant 0 : i32
    return %c0_i32, %c0_i32_0 : i32, i32
  }
  func.func @transform_6(%arg0: i32) -> (i32, i32) {
    %c0_i32 = arith.constant 0 : i32
    %c0_i32_0 = arith.constant 0 : i32
    %c0_i32_1 = arith.constant 0 : i32
    return %c0_i32, %c0_i32_0 : i32, i32
  }
  func.func @transform_7(%arg0: i32) -> (i32, i32) {
    %c0_i32 = arith.constant 0 : i32
    %c0_i32_0 = arith.constant 0 : i32
    %c0_i32_1 = arith.constant 0 : i32
    return %c0_i32, %c0_i32_0 : i32, i32
  }
  func.func @transform_8(%arg0: i32) -> (i32, i32) {
    %c0_i32 = arith.constant 0 : i32
    %c0_i32_0 = arith.constant 0 : i32
    %c0_i32_1 = arith.constant 0 : i32
    return %c0_i32, %c0_i32_0 : i32, i32
  }
  func.func @transform_9(%arg0: i32) -> (i32, i32) {
    %c0_i32 = arith.constant 0 : i32
    %c0_i32_0 = arith.constant 0 : i32
    return %arg0, %c0_i32 : i32, i32
  }
}

</mosaic_0001>

<bundles_post_ra>
// kernel: tpu_custom_call.1
= control target key start
LH: loop header
LB: loop body
LE: loop exit
PB: predicated region body
PF: predicated region fallthrough
CT: control target
= control target key end

     0   :  { %vm48_vm0 = vcmask 1041408   ;;  %vm49_vm1 = vcmask 1042432   ;;  %v521_v1 = vmov 0.0   ;;  %v522_v2 = vmov 65535   ;;  %s673_s0 = inlined_call_operand.vmem [shape: f32[8,5], index: 0, kind: input, shape index: {}]   ;;  %s674_s1 = inlined_call_operand.vmem [shape: bf16[5,32], index: 1, kind: input, shape index: {}]   ;;  %s675_s2 = inlined_call_operand.vmem [shape: f32[1,32], index: 2, kind: input, shape index: {}]   ;;  %s676_s3 = inlined_call_operand.vmem [shape: bf16[32,64], index: 3, kind: input, shape index: {}]   ;;  %s677_s4 = inlined_call_operand.vmem [shape: f32[1,64], index: 4, kind: input, shape index: {}]   ;;  %s678_s5 = inlined_call_operand.vmem [shape: bf16[64,128], index: 5, kind: input, shape index: {}]   ;;  %s679_s6 = inlined_call_operand.vmem [shape: f32[1,128], index: 6, kind: input, shape index: {}]   ;;  %s680_s7 = inlined_call_operand.vmem [shape: bf16[128,8], index: 7, kind: input, shape index: {}]   ;;  %s681_s8 = inlined_call_operand.vmem [shape: f32[1,8], index: 8, kind: input, shape index: {}]   ;;  %s682_s9 = inlined_call_operand.hbm [shape: f32[8,8], index: 9, kind: output, shape index: {}]  }
   0x1   :  { %v36_v0 = vld [vmem:[%s674_s1] sm:$0x7]  ;;  %429 = vmatprep.subr.bf16.mxu0 %v521_v1  ;;  %v50_v3 = vsel %vm48_vm0, 4294967295, %v522_v2  ;;  %455 = vmatprep.subr.bf16.mxu1 %v521_v1  ;;  %vm523_vm2 = vmmov 0   ;;  %vm44_vm3 = vcmask 39936  }
   0x2   :  { %v34_v4 = vld [vmem:[%s673_s0] sm:$0xff]  ;;  %v51_v5 = vsel %vm49_vm1, %v50_v3, 0  ;;  %431 = vmatprep.mubr.msk.bf16.mxu0 %vm523_vm2, %v521_v1  ;;  %471 = vmatprep.mubr.msk.bf16.mxu1 %vm523_vm2, %v521_v1 }
   0x3   :  { %v53_v6 = vand.u32 %v51_v5, %v36_v0  ;;  %v479_v7 = vld [vmem:[%s676_s3] sm:$0xff]   ;;  %v35_v8 = vpack.c.bf16 %v34_v4, %v34_v4 }
   0x5   :  { %430 = vmatpush3.bf16.msra.mxu0 %v53_v6 }
   0x6   :  { %435 = vmatprep.subr.bf16.mxu0 %v521_v1 }
   0x8   :  { %432 = vmatmul.mubr.msk.bf16.vlgmr.msra.gmra.mrb[0].mxu0 %vm44_vm3, %v35_v8 }
   0x9   :  { %436 = vmatpush3.bf16.msra.mxu0 %v479_v7  ;;  %439 = vmatprep.mubr.msk.bf16.mxu0 %vm523_vm2, %v521_v1 }
   0xa   :  { %437 = vmatprep.subr.bf16.mxu0 %v521_v1 }
   0xb   :  { %14 = vsyncpa [#allocation3], 0  ;;  %v480_v9 = vld [vmem:[%s676_s3 + $0x8] sm:$0xff]   ;;  %v389_v10 = vld [vmem:[%s675_s2] ss:$0 sm:$0xff]  ;;  %vm120_vm4 = vcmask 261120  }
   0xc   :  { %v481_v17 = vld [vmem:[%s678_s5] sm:$0xff]   ;;  %v482_v19 = vld [vmem:[%s678_s5 + $0x8] sm:$0xff]   ;;  %v483_v20 = vld [vmem:[%s678_s5 + $0x10] sm:$0xff]   ;;  %vm205_vm5 = vcmask 523264   ;;  %vm362_vm6 = vcmask 64512  }
   0xd   :  { %438 = vmatpush3.bf16.msra.mxu0 %v480_v9  ;;  %v484_v21 = vld [vmem:[%s678_s5 + $0x18] sm:$0xff]   ;;  %v485_v22 = vld [vmem:[%s680_s7] sm:$0xff]   ;;  %v486_v23 = vld [vmem:[%s680_s7 + $0x8] sm:$0xff]  }
   0xe   :  { %443 = vmatprep.subr.bf16.mxu0 %v521_v1  ;;  %456 = vmatpush3.bf16.msra.mxu1 %v485_v22  ;;  %v487_v24 = vld [vmem:[%s680_s7 + $0x10] sm:$0xff]   ;;  %v488_v25 = vld [vmem:[%s680_s7 + $0x18] sm:$0xff]   ;;  %v489_v26 = vld [vmem:[%s680_s7 + $0x20] sm:$0xff]  }
   0xf   :  { %457 = vmatprep.subr.bf16.mxu1 %v521_v1  ;;  %v490_v27 = vld [vmem:[%s680_s7 + $0x28] sm:$0xff]   ;;  %v391_v28 = vld [vmem:[%s677_s4] ss:$0 sm:$0xff]  ;;  %v491_v36 = vld [vmem:[%s680_s7 + $0x30] sm:$0xff]  }
  0x10   :  { %v492_v37 = vld [vmem:[%s680_s7 + $0x38] sm:$0xff]   ;;  %v395_v38 = vld [vmem:[%s679_s6] ss:$0 sm:$0xff]  ;;  %s524_s6 = smov [#allocation2]  }
  0x11   :  { %v401_v46 = vld [vmem:[%s681_s8] ss:$0 sm:$0xff]  ;;  %s381_s7 = sshll.u32 %s524_s6, 4  ;;  %s382_s7 = int_to_ptr.vmem [resolvable:$true] %s381_s7 }
  0x12   :  { %458 = vmatpush3.bf16.msra.mxu1 %v486_v23  ;;  %s497_s8 = scalar_lea.vmem %s382_s7, 128  ;;  %p502_p1 = scmp.lt.s32.totalorder %s382_s7, %s382_s7 }
  0x13   :  { %459 = vmatprep.subr.bf16.mxu1 %v521_v1  ;;  %p498_p0 = scmp.ne.s32.totalorder %s382_s7, %s497_s8  ;;  %p503_p2 = scmp.lt.s32.totalorder %s497_s8, %s497_s8 }
  0x15   :  { %p504_p3 = por %p503_p2, %p502_p1 }
  0x16   :  { %460 = vmatpush3.bf16.msra.mxu1 %v487_v24 }
  0x17   :  { %461 = vmatprep.subr.bf16.mxu1 %v521_v1  ;;  %p505_p4 = pnand %p504_p3, %p498_p0 }
  0x1a   :  { %462 = vmatpush3.bf16.msra.mxu1 %v488_v25 }
  0x1b   :  { %463 = vmatprep.subr.bf16.mxu1 %v521_v1 }
  0x1e   :  { %464 = vmatpush3.bf16.msra.mxu1 %v489_v26 }
  0x1f   :  { %465 = vmatprep.subr.bf16.mxu1 %v521_v1 }
  0x22   :  { %466 = vmatpush3.bf16.msra.mxu1 %v490_v27 }
  0x23   :  { %467 = vmatprep.subr.bf16.mxu1 %v521_v1 }
  0x26   :  { %468 = vmatpush3.bf16.msra.mxu1 %v491_v36 }
  0x27   :  { %469 = vmatprep.subr.bf16.mxu1 %v521_v1 }
  0x2a   :  { %470 = vmatpush3.bf16.msra.mxu1 %v492_v37 }
  0xdb   :  { %v89_v11 = vpop.f32.mrb[0].mxu0 }
  0xdc   :  { %v90_v12 = vadd.f32 %v389_v10, %v89_v11  ;;  %v433_v13 = vpop.f32.mrb[1].mxu0 }
  0xdd   :  { %v92_v14 = vpop.f32.mrb[2].mxu0 }
  0xde   :  { %v95_v15 = vmax.f32 %v90_v12, 0.0  ;;  %v434_v16 = vpop.f32.mrb[3].mxu0 }
  0xe0   :  { %v96_v18 = vpack.c.bf16 %v95_v15, %v95_v15 }
  0xe2   :  { %440 = vmatmul.mubr.msk.bf16.vlgmr.msra.gmra.mrb[4].mxu0 %vm120_vm4, %v96_v18 }
  0xe3   :  { %444 = vmatpush3.bf16.msra.mxu0 %v481_v17  ;;  %451 = vmatprep.mubr.msk.bf16.mxu0 %vm523_vm2, %v521_v1 }
  0xe4   :  { %445 = vmatprep.subr.bf16.mxu0 %v521_v1 }
  0xe7   :  { %446 = vmatpush3.bf16.msra.mxu0 %v482_v19 }
  0xe8   :  { %447 = vmatprep.subr.bf16.mxu0 %v521_v1 }
  0xeb   :  { %448 = vmatpush3.bf16.msra.mxu0 %v483_v20 }
  0xec   :  { %449 = vmatprep.subr.bf16.mxu0 %v521_v1 }
  0xef   :  { %450 = vmatpush3.bf16.msra.mxu0 %v484_v21 }
 0x1b5   :  { %v158_v29 = vpop.f32.mrb[4].mxu0 }
 0x1b6   :  { %v159_v30 = vadd.f32 %v391_v28, %v158_v29  ;;  %v441_v31 = vpop.f32.mrb[5].mxu0 }
 0x1b7   :  { %v161_v32 = vpop.f32.mrb[6].mxu0 }
 0x1b8   :  { %v164_v33 = vmax.f32 %v159_v30, 0.0  ;;  %v442_v34 = vpop.f32.mrb[7].mxu0 }
 0x1ba   :  { %v165_v35 = vpack.c.bf16 %v164_v33, %v164_v33 }
 0x1bc   :  { %452 = vmatmul.mubr.msk.bf16.vlgmr.msra.gmra.mrb[8].mxu0 %vm205_vm5, %v165_v35 }
 0x28f   :  { %v243_v39 = vpop.f32.mrb[8].mxu0 }
 0x290   :  { %v244_v40 = vadd.f32 %v395_v38, %v243_v39  ;;  %v453_v41 = vpop.f32.mrb[9].mxu0 }
 0x291   :  { %v246_v42 = vpop.f32.mrb[10].mxu0 }
 0x292   :  { %v249_v43 = vmax.f32 %v244_v40, 0.0  ;;  %v454_v44 = vpop.f32.mrb[11].mxu0 }
 0x294   :  { %v250_v45 = vpack.c.bf16 %v249_v43, %v249_v43 }
 0x296   :  { %472 = vmatmul.mubr.bf16.vlgmr.msra.gmra.mrb[0].mxu1 %v250_v45 }
 0x369   :  { %v356_v47 = vpop.f32.mrb[0].mxu1 }
 0x36a   :  { %v357_v48 = vadd.f32 %v401_v46, %v356_v47  ;;  %v473_v49 = vpop.f32.mrb[1].mxu1 }
 0x36b   :  { %v359_v50 = vpop.f32.mrb[2].mxu1 }
 0x36c   :  { %v474_v51 = vpop.f32.mrb[3].mxu1  ;;  %v363_v52 = vsel %vm362_vm6, %v357_v48, -inf }
 0x36d   :  { %364 = vmax.xlane.f32.xlu0 %v363_v52 }
 0x3fa   :  { %v365_v53 = vpop.xlane.xlu0 %364 }
 0x3fb   :  { %v366_v54 = vsub.f32 %v357_v48, %v365_v53 }
 0x3fd   :  { %v367_v55 = vmul.f32 1.442695, %v366_v54 }
 0x3ff   :  { %493 = vpow2.f32 %v367_v55 }
 0x409   :  { %v494_v56 = vpop.eup %493 }
 0x40a   :  { %v369_v57 = vsel %vm362_vm6, %v494_v56, 0.0 }
 0x40b   :  { %370 = vadd.xlane.f32.xlu0 %v369_v57 }
 0x498   :  { %v371_v58 = vpop.xlane.xlu0 %370 }
 0x499   :  { %495 = vrcp.f32 %v371_v58 }
 0x4a3   :  { %v496_v59 = vpop.eup %495 }
 0x4a4   :  { %v373_v60 = vmul.f32 %v496_v59, %v494_v56 }
 0x4a6   :  { %374 = vst.msk [vmem:[#allocation2] sm:$0xff] %vm362_vm6, %v373_v60 }
 0x4a7   :  { %508 = shalt.err (!%p505_p4)
}
 0x4a8   :  { %s509_s20 = scalar_lea.hbm %s682_s9, 128 }
 0x4a9   :  { %p510_p5 = scmp.ne.s32.totalorder %s682_s9, %s509_s20  ;;  %p513_p6 = scmp.lt.u32.totalorder %s509_s20, %s682_s9 }
 0x4ab   :  { %p515_p7 = pnand %p513_p6, %p510_p5 }
 0x4ad   :  { %518 = shalt.err (!%p515_p7)
}
 0x4ae   :  { %384 = dma.vmem_to_hbm [thread:$0]  %s382_s7, 128, %s682_s9, [#allocation3]  }
 0x4af   :  { %519 = dma.done.wait [#allocation3], 128  }
 0x4b0   :  { %520 = vsyncadd [#allocation3], 4294967168 }
 0x4b1   :  { %388 = vsyncpa [#allocation3], 1 }

</bundles_post_ra>
